<compile_context>
chip_gen: v7x
topology: tpu7x:2x2x1
jax: 0.10.0
libtpu: 0.0.40
codegen_flags: <defaults>
</compile_context>

<pallas_src>
import jax
import jax.numpy as jnp
from jax.experimental import pallas as pl
from jax.experimental.pallas import tpu as pltpu


def mlp0_kernel(x_ref, w1_ref, b1_ref, w2_ref, b2_ref, w3_ref, b3_ref, o_ref):
    # Layer 1: in-kernel cast of x to the weight dtype (zero extra HBM traffic), MXU
    # matmul with f32 accumulation, bias-add + tanh in f32 on the VPU/EUP.
    x = x_ref[...].astype(w1_ref.dtype)
    h = jnp.dot(x, w1_ref[...], preferred_element_type=jnp.float32)
    h = jnp.tanh(h + b1_ref[...])
    # Layer 2 on the MXU, f32 accumulation, f32 elementwise.
    h = jnp.dot(h.astype(w2_ref.dtype), w2_ref[...], preferred_element_type=jnp.float32)
    h = jnp.tanh(h + b2_ref[...])
    # Output layer (h2 -> 1): w3 is a (1, h2) row vector; w3 @ h.T yields a lane-dense
    # (1, block_b) row directly (batch on lanes), so the store path is unmasked instead
    # of lane-width-1.  b3 is a scalar read from SMEM.
    o = jnp.dot(w3_ref[...], h.T, preferred_element_type=jnp.float32)
    o = o + b3_ref[0]
    o_ref[...] = o.astype(o_ref.dtype).reshape(o_ref.shape)


_TILE_VMEM_BUDGET_BYTES = 24 << 20   # double-buffered x/out tiles, safe on all gens
_VMEM_LIMIT_CAP_BYTES = 48 << 20     # below v7x's 64 MiB physical VMEM per TC


def _round_up(v, m):
    return ((v + m - 1) // m) * m


def mlp0_forward(x, w1, b1, w2, b2, w3, b3, *, block_b=None, compute_dtype=None):
    """Fused MLP0 forward.

    Shapes (weights stored transposed vs. torch, i.e. (fan_in, fan_out)):
      x: (B, in_size), w1: (in_size, h1), b1: (1, h1),
      w2: (h1, h2),    b2: (1, h2),
      w3: (1, h2)   -- output-layer weights as a row vector,
      b3: (1,)      -- scalar bias, placed in SMEM.
    """
    B, in_size = x.shape
    h1 = w1.shape[1]
    h2 = w2.shape[1]
    out_dtype = x.dtype
    x_itemsize = jnp.dtype(x.dtype).itemsize
    out_itemsize = jnp.dtype(out_dtype).itemsize

    if compute_dtype is not None:
        # Cast only the (small, VMEM-resident) MXU weights at the boundary.  x is cast
        # inside the kernel; biases / w3 / b3 stay f32 for the elementwise math.
        w1 = w1.astype(compute_dtype)
        w2 = w2.astype(compute_dtype)

    # ---- batch tile selection ------------------------------------------------------
    auto = block_b is None
    if auto:
        block_b = 1024                              # large tiles amortize per-step cost
    block_b = min(block_b, _round_up(B, 8))         # never tile past the padded batch
    if auto and B >= 16:
        # keep >= 2 grid steps: keeps the pipeline alive and feeds both v7x TCs
        block_b = min(block_b, _round_up(pl.cdiv(B, 2), 8))
    block_b = max(8, (block_b // 8) * 8)            # sublane multiple of 8
    per_row_bytes = 2 * (in_size * x_itemsize + out_itemsize)   # double-buffered x + out
    while block_b > 8 and block_b * per_row_bytes > _TILE_VMEM_BUDGET_BYTES:
        block_b = max(8, (block_b // 2 // 8) * 8)

    num_blocks = pl.cdiv(B, block_b)
    b_pad = num_blocks * block_b
    if b_pad != B:
        x = jnp.pad(x, ((0, b_pad - B), (0, 0)))

    # ---- explicit VMEM budget --------------------------------------------------------
    w_itemsize = jnp.dtype(w1.dtype).itemsize
    tile_bytes = block_b * per_row_bytes
    resident_bytes = 2 * ((in_size * h1 + h1 * h2) * w_itemsize   # w1, w2 (x2: buffering)
                          + (h1 + 2 * h2) * 4)                    # b1, b2, w3 (f32)
    vmem_limit = tile_bytes + resident_bytes + (4 << 20)          # headroom
    vmem_limit = max(8 << 20, min(vmem_limit, _VMEM_LIMIT_CAP_BYTES))

    out = pl.pallas_call(
        mlp0_kernel,
        out_shape=jax.ShapeDtypeStruct((num_blocks, 1, block_b), out_dtype),
        grid=(num_blocks,),
        in_specs=[
            pl.BlockSpec((block_b, in_size), lambda i: (i, 0)),   # x: tiled over batch
            pl.BlockSpec((in_size, h1), lambda i: (0, 0)),        # w1: VMEM-resident
            pl.BlockSpec((1, h1), lambda i: (0, 0)),              # b1: VMEM-resident
            pl.BlockSpec((h1, h2), lambda i: (0, 0)),             # w2: VMEM-resident
            pl.BlockSpec((1, h2), lambda i: (0, 0)),              # b2: VMEM-resident
            pl.BlockSpec((1, h2), lambda i: (0, 0)),              # w3 row vector
            pl.BlockSpec(memory_space=pltpu.MemorySpace.SMEM),    # b3: (1,) scalar
        ],
        out_specs=pl.BlockSpec((1, 1, block_b), lambda i: (i, 0, 0)),  # lane-dense row
        compiler_params=pltpu.CompilerParams(
            dimension_semantics=("parallel",),   # batch is independent -> 2 TCs on v7x
            vmem_limit_bytes=vmem_limit,
        ),
    )(x, w1, b1, w2, b2, w3, b3)

    out = out.reshape(b_pad, 1)
    if b_pad != B:
        out = out[:B]
    return out


def init_params(key, in_size, h1, h2, dtype=jnp.float32):
    """Deterministic init mimicking nn.Linear's uniform(-1/sqrt(fan_in), 1/sqrt(fan_in)).
    Hidden-layer weights are stored (fan_in, fan_out); the output-layer weight is a
    (1, h2) row vector and its bias a (1,) scalar for the SMEM path."""
    ks = jax.random.split(key, 6)

    def linear(kw, kb, fan_in, fan_out):
        bound = 1.0 / jnp.sqrt(jnp.array(fan_in, dtype))
        w = jax.random.uniform(kw, (fan_in, fan_out), dtype, -bound, bound)
        b = jax.random.uniform(kb, (1, fan_out), dtype, -bound, bound)
        return w, b

    w1, b1 = linear(ks[0], ks[1], in_size, h1)
    w2, b2 = linear(ks[2], ks[3], h1, h2)
    w3_col, b3_2d = linear(ks[4], ks[5], h2, 1)   # (h2, 1), (1, 1)
    w3 = w3_col.T                                  # (1, h2) row vector
    b3 = b3_2d.reshape((1,))                       # (1,) scalar for SMEM
    return w1, b1, w2, b2, w3, b3


def mlp0_reference(x, w1, b1, w2, b2, w3, b3):
    h = jnp.tanh(x @ w1 + b1)
    h = jnp.tanh(h @ w2 + b2)
    return h @ w3.T + b3


if __name__ == "__main__":
    key = jax.random.PRNGKey(0)
    k_x, k_x2, k_p = jax.random.split(key, 3)

    in_size, h1, h2 = 16, 32, 32
    params = init_params(k_p, in_size, h1, h2)

    # 1) f32 path, divisible batch (auto tile -> block_b=32, grid=(2,)).
    B = 64
    x = jax.random.normal(k_x, (B, in_size), jnp.float32)
    out = jax.block_until_ready(mlp0_forward(x, *params))
    ref = mlp0_reference(x, *params)
    assert out.shape == (B, 1), out.shape
    assert jnp.allclose(out, ref, atol=1e-5, rtol=1e-5), "f32 mismatch vs reference"

    # 2) f32 path, non-divisible batch (exercises the cdiv grid + zero padding path).
    B2 = 50
    x2 = jax.random.normal(k_x2, (B2, in_size), jnp.float32)
    out2 = jax.block_until_ready(mlp0_forward(x2, *params))
    ref2 = mlp0_reference(x2, *params)
    assert out2.shape == (B2, 1), out2.shape
    assert jnp.allclose(out2, ref2, atol=1e-5, rtol=1e-5), "padded-batch mismatch"

    # 3) bf16 MXU-operand path (in-kernel x cast, f32 accumulation/elementwise);
    #    validated with a loose tolerance appropriate for bf16 rounding.
    out_bf16 = jax.block_until_ready(
        mlp0_forward(x, *params, compute_dtype=jnp.bfloat16))
    assert out_bf16.shape == (B, 1), out_bf16.shape
    assert jnp.allclose(out_bf16, ref, atol=1e-1, rtol=0), "bf16 path mismatch"

    print("KERNEL_OK")
</pallas_src>

<mosaic_0001>
module attributes {stable_mosaic.version = 11 : i64} {
  func.func @mlp0_kernel(%arg0: i32, %arg1: memref<32x16xf32, #tpu.memory_space<vmem>>, %arg2: memref<16x32xf32, #tpu.memory_space<vmem>>, %arg3: memref<1x32xf32, #tpu.memory_space<vmem>>, %arg4: memref<32x32xf32, #tpu.memory_space<vmem>>, %arg5: memref<1x32xf32, #tpu.memory_space<vmem>>, %arg6: memref<1x32xf32, #tpu.memory_space<vmem>>, %arg7: memref<1xf32, #tpu.memory_space<smem>>, %arg8: memref<1x1x32xf32, #tpu.memory_space<vmem>>) attributes {dimension_semantics = [#tpu.dimension_semantics<parallel>], iteration_bounds = array<i64: 2>, scalar_prefetch = 0 : i64, scratch_operands = 0 : i64, tpu.core_type = #tpu.core_type<tc>, window_params = [{transform_indices = @transform_0, window_bounds = array<i64: 32, 16>}, {pipeline_mode = #tpu.pipeline_mode<synchronous>, transform_indices = @transform_1, window_bounds = array<i64: 16, 32>}, {pipeline_mode = #tpu.pipeline_mode<synchronous>, transform_indices = @transform_2, window_bounds = array<i64: 1, 32>}, {pipeline_mode = #tpu.pipeline_mode<synchronous>, transform_indices = @transform_3, window_bounds = array<i64: 32, 32>}, {pipeline_mode = #tpu.pipeline_mode<synchronous>, transform_indices = @transform_4, window_bounds = array<i64: 1, 32>}, {pipeline_mode = #tpu.pipeline_mode<synchronous>, transform_indices = @transform_5, window_bounds = array<i64: 1, 32>}, {transform_indices = @transform_6, window_bounds = array<i64: 1>}, {transform_indices = @transform_7, window_bounds = array<i64: 1, 1, 32>}]} {
    %c0 = arith.constant 0 : index
    %c0_0 = arith.constant 0 : index
    %0 = vector.load %arg1[%c0, %c0_0] : memref<32x16xf32, #tpu.memory_space<vmem>>, vector<32x16xf32>
    %c0_1 = arith.constant 0 : index
    %c0_2 = arith.constant 0 : index
    %1 = vector.load %arg2[%c0_1, %c0_2] : memref<16x32xf32, #tpu.memory_space<vmem>>, vector<16x32xf32>
    %cst = arith.constant dense<0.000000e+00> : vector<32x32xf32>
    %2 = tpu.matmul %0, %1, %cst {dimension_numbers = #tpu.dot_dimension_numbers<[1], [0], [0], [1], [0, 0, 1, 1], [], []>} : vector<32x16xf32>, vector<16x32xf32>, vector<32x32xf32> -> vector<32x32xf32>
    %c0_3 = arith.constant 0 : index
    %c0_4 = arith.constant 0 : index
    %3 = vector.load %arg3[%c0_3, %c0_4] : memref<1x32xf32, #tpu.memory_space<vmem>>, vector<1x32xf32>
    %4 = vector.broadcast %3 : vector<1x32xf32> to vector<32x32xf32>
    %5 = arith.addf %2, %4 : vector<32x32xf32>
    %6 = math.tanh %5 : vector<32x32xf32>
    %c0_5 = arith.constant 0 : index
    %c0_6 = arith.constant 0 : index
    %7 = vector.load %arg4[%c0_5, %c0_6] : memref<32x32xf32, #tpu.memory_space<vmem>>, vector<32x32xf32>
    %cst_7 = arith.constant dense<0.000000e+00> : vector<32x32xf32>
    %8 = tpu.matmul %6, %7, %cst_7 {dimension_numbers = #tpu.dot_dimension_numbers<[1], [0], [0], [1], [0, 0, 1, 1], [], []>} : vector<32x32xf32>, vector<32x32xf32>, vector<32x32xf32> -> vector<32x32xf32>
    %c0_8 = arith.constant 0 : index
    %c0_9 = arith.constant 0 : index
    %9 = vector.load %arg5[%c0_8, %c0_9] : memref<1x32xf32, #tpu.memory_space<vmem>>, vector<1x32xf32>
    %10 = vector.broadcast %9 : vector<1x32xf32> to vector<32x32xf32>
    %11 = arith.addf %8, %10 : vector<32x32xf32>
    %12 = math.tanh %11 : vector<32x32xf32>
    %c0_10 = arith.constant 0 : index
    %c0_11 = arith.constant 0 : index
    %13 = vector.load %arg6[%c0_10, %c0_11] : memref<1x32xf32, #tpu.memory_space<vmem>>, vector<1x32xf32>
    %14 = tpu.transpose %12, [1, 0] : vector<32x32xf32> -> vector<32x32xf32>
    %cst_12 = arith.constant dense<0.000000e+00> : vector<1x32xf32>
    %15 = tpu.matmul %13, %14, %cst_12 {dimension_numbers = #tpu.dot_dimension_numbers<[1], [0], [0], [1], [0, 0, 1, 1], [], []>} : vector<1x32xf32>, vector<32x32xf32>, vector<1x32xf32> -> vector<1x32xf32>
    %c0_13 = arith.constant 0 : index
    %16 = memref.load %arg7[%c0_13] : memref<1xf32, #tpu.memory_space<smem>>
    %17 = vector.broadcast %16 : f32 to vector<1x32xf32>
    %18 = arith.addf %15, %17 : vector<1x32xf32>
    %19 = vector.shape_cast %18 : vector<1x32xf32> to vector<1x1x32xf32>
    %c0_14 = arith.constant 0 : index
    %c0_15 = arith.constant 0 : index
    %c0_16 = arith.constant 0 : index
    %20 = vector.load %arg8[%c0_14, %c0_15, %c0_16] : memref<1x1x32xf32, #tpu.memory_space<vmem>>, vector<1x1x32xf32>
    tpu.vector_store %arg8[%c0_14, %c0_15, %c0_16], %19 {strides = array<i32>} : memref<1x1x32xf32, #tpu.memory_space<vmem>>, vector<1x1x32xf32>,
    return
  }
  func.func @transform_0(%arg0: i32) -> (i32, i32) {
    %c0_i32 = arith.constant 0 : i32
    %c0_i32_0 = arith.constant 0 : i32
    return %arg0, %c0_i32 : i32, i32
  }
  func.func @transform_1(%arg0: i32) -> (i32, i32) {
    %c0_i32 = arith.constant 0 : i32
    %c0_i32_0 = arith.constant 0 : i32
    %c0_i32_1 = arith.constant 0 : i32
    return %c0_i32, %c0_i32_0 : i32, i32
  }
  func.func @transform_2(%arg0: i32) -> (i32, i32) {
    %c0_i32 = arith.constant 0 : i32
    %c0_i32_0 = arith.constant 0 : i32
    %c0_i32_1 = arith.constant 0 : i32
    return %c0_i32, %c0_i32_0 : i32, i32
  }
  func.func @transform_3(%arg0: i32) -> (i32, i32) {
    %c0_i32 = arith.constant 0 : i32
    %c0_i32_0 = arith.constant 0 : i32
    %c0_i32_1 = arith.constant 0 : i32
    return %c0_i32, %c0_i32_0 : i32, i32
  }
  func.func @transform_4(%arg0: i32) -> (i32, i32) {
    %c0_i32 = arith.constant 0 : i32
    %c0_i32_0 = arith.constant 0 : i32
    %c0_i32_1 = arith.constant 0 : i32
    return %c0_i32, %c0_i32_0 : i32, i32
  }
  func.func @transform_5(%arg0: i32) -> (i32, i32) {
    %c0_i32 = arith.constant 0 : i32
    %c0_i32_0 = arith.constant 0 : i32
    %c0_i32_1 = arith.constant 0 : i32
    return %c0_i32, %c0_i32_0 : i32, i32
  }
  func.func @transform_6(%arg0: i32) -> i32 {
    %c0_i32 = arith.constant 0 : i32
    %c0_i32_0 = arith.constant 0 : i32
    return %c0_i32 : i32
  }
  func.func @transform_7(%arg0: i32) -> (i32, i32, i32) {
    %c0_i32 = arith.constant 0 : i32
    %c0_i32_0 = arith.constant 0 : i32
    %c0_i32_1 = arith.constant 0 : i32
    return %arg0, %c0_i32, %c0_i32_0 : i32, i32, i32
  }
}

</mosaic_0001>

<bundles_post_ra>
// kernel: tpu_custom_call.1
= control target key start
LH: loop header
LB: loop body
LE: loop exit
PB: predicated region body
PF: predicated region fallthrough
CT: control target
= control target key end

     0   :  { %s1065_s0 = inlined_call_operand.vmem [shape: f32[64,16], index: 0, kind: input, shape index: {}]   ;;  %s1066_s1 = inlined_call_operand.vmem [shape: f32[16,32], index: 1, kind: input, shape index: {}]   ;;  %s1067_s2 = inlined_call_operand.vmem [shape: f32[1,32], index: 2, kind: input, shape index: {}]   ;;  %s1068_s3 = inlined_call_operand.vmem [shape: f32[32,32], index: 3, kind: input, shape index: {}]   ;;  %s1069_s4 = inlined_call_operand.vmem [shape: f32[1,32], index: 4, kind: input, shape index: {}]   ;;  %s1070_s5 = inlined_call_operand.vmem [shape: f32[1,32], index: 5, kind: input, shape index: {}]   ;;  %s1071_s6 = inlined_call_operand.<no memory space> [shape: f32[1], index: 6, kind: input, shape index: {}]   ;;  %s1072_s7 = inlined_call_operand.hbm [shape: f32[2,1,32], index: 7, kind: output, shape index: {}]  }
   0x1   :  { %12 = sst [smem:[#allocation2]] %s1071_s6 }
   0x2   :  { %13 = vsyncpa [#allocation4], 0 }
   0x3   :  { %15 = vsyncpa [#allocation4 + $0x1], 0  ;;  %s932_s26 = smov 0   ;;  %s934_s27 = smov 0  }
   0x4   :  { %s936_s28 = smov 0   ;;  %s938_s29 = smov 0  }
   0x5 LB: > { %s953_s6 = sadd.s32 4294967295, %s883_s29   ;;  %s665_s30 = sadd.s32 4294967294, %s883_s29   ;;  %s883_s29 = sphi %s938_s29, %s1078_s29   ;;  %s879_s28 = sphi %s936_s28, %s1077_s28   ;;  %s875_s27 = sphi %s934_s27, %s1076_s27   ;;  %s871_s26 = sphi %s932_s26, %s1075_s26  }
   0x6   : > { %s957_s8 = sadd.s32 1, %s883_s29   ;;  %s180_s9 = sadd.s32 1, %s879_s28 }
   0x7   : > { %s177_s10 = ssub.s32 %s883_s29, %s957_s8  ;;  %p190_p0 = scmp.ne.s32.totalorder %s879_s28, %s875_s27 }
   0x8   : > { %p178_p1 = scmp.eq.s32.totalorder %s177_s10, 0  ;;  %p191_p2 = scmp.eq.s32.totalorder %s953_s6, 1 }
   0x9   : > { %p196_p3 = scmp.ne.s32.totalorder %s875_s27, %s871_s26  ;;  %p197_p4 = scmp.eq.s32.totalorder %s665_s30, 1 }
   0xa   : > { %s968_s11 = scalar_select %p178_p1, %s879_s28, %s180_s9  }
   0xb   : > { %p970_p5 = por %p191_p2, %p190_p0  ;;  %p974_p6 = por %p197_p4, %p196_p3 }
   0xc   : > { %p668_p7 = scmp.ge.s32.totalorder %s883_s29, 1  ;;  %p242_p8 = scmp.lt.s32.totalorder %s883_s29, 3 }
   0xe   : > { %p243_p9 = pnand %p668_p7, %p242_p8 }
   0xf   : > { %v283_v0 = vld [vmem:[%s1066_s1] sm:$0xff] (!%p243_p9)  ;;  %v284_v1 = vld [vmem:[%s1066_s1 + $0x8] sm:$0xff] (!%p243_p9)  ;;  %s669_s18 = sshll.u32 (!%p243_p9), %s953_s6, 2  ;;  %vm292_vm0 = vcmask (!%p243_p9), 130048   ;;  %v396_v10 = vld [vmem:[%s1068_s3 + $0x10] sm:$0xff] (!%p243_p9)  ;;  %vm405_vm1 = vcmask (!%p243_p9), 261120  }
  0x10   : > { %246 = sbr.rel (%p243_p9) target bundleno = 726 (0x2d6), region = 48  ;;  %v743_v2 = vpack.c.bf16 (!%p243_p9), %v284_v1, %v283_v0  ;;  %p274_p10 = scmp.lt.s32.totalorder (!%p243_p9), %s669_s18, 7  ;;  %v394_v7 = vld [vmem:[%s1068_s3] sm:$0xff] (!%p243_p9)  ;;  %v395_v8 = vld [vmem:[%s1068_s3 + $0x8] sm:$0xff] (!%p243_p9)  ;;  %v397_v11 = vld [vmem:[%s1068_s3 + $0x18] sm:$0xff] (!%p243_p9)  ;;  %v885_v26 = vmov (!%p243_p9), 0.0|0.0  }
  0x11   : > { %v747_v9 = vpack.c.bf16 (!%p243_p9), %v395_v8, %v394_v7  ;;  %v751_v12 = vpack.c.bf16 (!%p243_p9), %v397_v11, %v396_v10  ;;  %v671_v13 = vld [vmem:[%s1067_s2] ss:$0 sm:$0xff] (!%p243_p9)  ;;  %755 = vmatprep.subr.bf16.mxu0 (!%p243_p9), %v885_v26  ;;  %vm886_vm2 = vmmov (!%p243_p9), 0   ;;  %v887_v27 = vmov (!%p243_p9), 0.0   ;;  %vm757_vm3 = vmpackc.low (!%p243_p9), %vm405_vm1, %vm405_vm1  ;;  %s271_s23 = sand.u32 (!%p243_p9), 1, %s875_s27   ;;  %s686_s24 = sshll.u32 (!%p243_p9), %s953_s6, 4 }
  0x12   : > { %744 = vmatprep.subr.bf16.mxu1 (!%p243_p9), %v743_v2  ;;  %740 = vmatprep.mubr.msk.f32.mxu0 (!%p243_p9), %vm886_vm2, %v887_v27  ;;  %v676_v28 = vld [vmem:[%s1069_s4] ss:$0 sm:$0xff] (!%p243_p9)  ;;  %s272_s25 = scalar_lea.vmem (!%p243_p9), [#allocation3], %s271_s23  ;;  %vm595_vm4 = vcmask (!%p243_p9), 253952   ;;  %s1023_s14 = scalar_lea.hbm (!%p243_p9), %s1072_s7, %s686_s24 }
  0x13   : > { %746 = vmatpush3.bf16.msra.mxu1 (!%p243_p9), %v743_v2  ;;  %v507_v43 = vld [vmem:[%s1070_s5] sm:$0x1] (!%p243_p9)  ;;  %s610_s30 = sshll.u32 (!%p243_p9), %s272_s25, 4  ;;  %s598_s15 = scalar_lea.sflag (!%p243_p9), [#allocation4], %s271_s23  ;;  %s1025_s30 = int_to_ptr.vmem [resolvable:$true] %s610_s30 }
  0x14   : > { %748 = vmatprep.subr.bf16.mxu1 (!%p243_p9), %v747_v9  ;;  %s821_s16 = scalar_lea.vmem (!%p243_p9), %s1025_s30, 16  ;;  %s888_s6 = smov (!%p243_p9), [#allocation3]  }
  0x15   : > { %p822_p11 = scmp.ne.s32.totalorder (!%p243_p9), %s1025_s30, %s821_s16  ;;  %s825_s17 = sshll.u32 (!%p243_p9), %s888_s6, 4  ;;  %s826_s17 = int_to_ptr.vmem [resolvable:$false] %s825_s17 }
  0x16   : > { %p828_p0 = scmp.lt.s32.totalorder (!%p243_p9), %s1025_s30, %s826_s17 }
  0x17   : > { %s1080_s18 = smov (!%p274_p10, %s669_s18), 7  ;;  %p823_p12 = pnand %p822_p11, %p970_p5 }
  0x18   : > { %s670_s19 = sshll.u32 %s1080_s18, 3  ;;  %s827_s18 = scalar_lea.vmem %s826_s17, 32 }
  0x19   : > { %s277_s22 = scalar_lea.vmem %s1065_s0, %s670_s19  ;;  %p824_p13 = pneg %p823_p12 }
  0x1a   : > { %v279_v3 = vld [vmem:[%s277_s22] sm:$0xff]  ;;  %v280_v4 = vld [vmem:[%s277_s22 + $0x8] sm:$0xff]  ;;  %v281_v5 = vld [vmem:[%s277_s22 + $0x10] sm:$0xff]  ;;  %p829_p1 = scmp.lt.s32.totalorder %s827_s18, %s821_s16 }
  0x1b   : > { %712 = vmatprep.mubr.msk.f32.mxu1 %vm292_vm0, %v279_v3  ;;  %v282_v6 = vld [vmem:[%s277_s22 + $0x18] sm:$0xff]  ;;  %s508_s22 = sld [smem:[#allocation2]] }
  0x1c   : > { %713 = vmatmul.mubr.msk.f32.vlgmr.msra.gmra.mrb[0].mxu1 %vm292_vm0, %v280_v4  ;;  %p830_p2 = por %p829_p1, %p828_p0 }
  0x1d   : > { %715 = vmatprep.mubr.msk.f32.mxu1 %vm292_vm0, %v281_v5  ;;  %750 = vmatpush3.bf16.msra.mxu1 %v747_v9 }
  0x1e   : > { %752 = vmatprep.subr.bf16.mxu1 %v751_v12  ;;  %p831_p3 = pnand %p830_p2, %p824_p13 }
  0x20   : > { %716 = vmatmul.mubr.msk.f32.gmra.mrb[2].mxu1 %vm292_vm0, %v282_v6 }
  0x21   : > { %754 = vmatpush3.bf16.msra.mxu1 %v751_v12  ;;  %v509_v44 = vstv %s508_s22 }
  0xef   : > { %v714_v14 = vpop.f32.mrb[0].mxu1 }
  0xf0   : > { %v377_v15 = vadd.f32 %v714_v14, %v671_v13  ;;  %v371_v16 = vpop.f32.mrb[1].mxu1 }
  0xf1   : > { %v372_v17 = vadd.f32 %v671_v13, %v371_v16 }
  0xf3   : > { %805 = vtanh.f32 %v372_v17  ;;  %v717_v18 = vpop.f32.mrb[2].mxu1 }
  0xf4   : > { %807 = vtanh.f32 %v377_v15  ;;  %v387_v19 = vadd.f32 %v717_v18, %v671_v13  ;;  %v381_v20 = vpop.f32.mrb[3].mxu1 }
  0xf5   : > { %v382_v21 = vadd.f32 %v671_v13, %v381_v20 }
  0xf6   : > { %809 = vtanh.f32 %v387_v19 }
  0xf7   : > { %811 = vtanh.f32 %v382_v21 }
  0xfd   : > { %v806_v22 = vpop.eup %805 }
  0xfe   : > { %v808_v23 = vpop.eup %807  ;;  %726 = vmatprep.mubr.msk.f32.mxu1 %vm405_vm1, %v806_v22 }
  0xff   : > { %727 = vmatmul.mubr.msk.f32.vlgmr.msra.gmra.mrb[4].mxu1 %vm405_vm1, %v808_v23 }
 0x100   : > { %v810_v24 = vpop.eup %809 }
 0x101   : > { %v812_v25 = vpop.eup %811 }
 0x102   : > { %729 = vmatprep.mubr.msk.f32.mxu1 %vm405_vm1, %v812_v25 }
 0x103   : > { %730 = vmatmul.mubr.msk.f32.gmra.mrb[6].mxu1 %vm405_vm1, %v810_v24 }
 0x1d2   : > { %v728_v29 = vpop.f32.mrb[4].mxu1 }
 0x1d3   : > { %v490_v30 = vadd.f32 %v728_v29, %v676_v28  ;;  %v484_v31 = vpop.f32.mrb[5].mxu1 }
 0x1d4   : > { %v485_v32 = vadd.f32 %v676_v28, %v484_v31 }
 0x1d5   : > { %813 = vtanh.f32 %v490_v30 }
 0x1d6   : > { %815 = vtanh.f32 %v485_v32  ;;  %v731_v33 = vpop.f32.mrb[6].mxu1 }
 0x1d7   : > { %v500_v34 = vadd.f32 %v731_v33, %v676_v28  ;;  %v494_v35 = vpop.f32.mrb[7].mxu1 }
 0x1d8   : > { %v495_v36 = vadd.f32 %v676_v28, %v494_v35 }
 0x1d9   : > { %817 = vtanh.f32 %v500_v34 }
 0x1da   : > { %819 = vtanh.f32 %v495_v36 }
 0x1df   : > { %v814_v37 = vpop.eup %813 }
 0x1e0   : > { %v816_v38 = vpop.eup %815 }
 0x1e1   : > { %v756_v39 = vpack.c.bf16 %v814_v37, %v816_v38 }
 0x1e3   : > { %v818_v40 = vpop.eup %817  ;;  %758 = vmatpush3.bf16.xpose.msk.msra.mxu0 %vm757_vm3, %v756_v39 }
 0x1e4   : > { %v820_v41 = vpop.eup %819  ;;  %759 = vmatprep.subr.bf16.mxu0 %v885_v26 }
 0x1e5   : > { %v760_v42 = vpack.c.bf16 %v818_v40, %v820_v41 }
 0x1eb   : > { %762 = vmatpush3.bf16.xpose.msk.msra.mxu0 %vm757_vm3, %v760_v42 }
 0x1f2   : > { %741 = vmatmul.mubr.msk.f32.vlgmr.msra.gmra.mrb[0].mxu0 %vm405_vm1, %v507_v43 }
 0x2c5   : > { %v591_v45 = vpop.f32.mrb[0].mxu0 }
 0x2c6   : > { %v592_v46 = vadd.f32 %v591_v45, %v509_v44  ;;  %v742_v47 = vpop.f32.mrb[1].mxu0 }
 0x2c8   : > { %596 = vst.msk [vmem:[%s272_s25] sm:$0x1] %vm595_vm4, %v592_v46 }
 0x2c9   : > { %834 = shalt.err (!%p831_p3)
}
 0x2ca   : > { %s835_s19 = scalar_lea.hbm %s1023_s14, 16  ;;  %s839_s22 = scalar_lea.hbm %s1072_s7, 32 }
 0x2cb   : > { %p836_p4 = scmp.ne.s32.totalorder %s1023_s14, %s835_s19  ;;  %p840_p9 = scmp.lt.u32.totalorder %s1023_s14, %s1072_s7 }
 0x2cc   : > { %p841_p10 = scmp.lt.u32.totalorder %s839_s22, %s835_s19  ;;  %p843_p12 = scmp.lt.u32.totalorder %s835_s19, %s1023_s14 }
 0x2cd   : > { %p837_p7 = pnand %p836_p4, %p970_p5 }
 0x2ce   : > { %p842_p11 = por %p841_p10, %p840_p9 }
 0x2cf   : > { %p838_p8 = pneg %p837_p7 }
 0x2d0   : > { %p844_p13 = por %p843_p12, %p842_p11 }
 0x2d2   : > { %p845_p0 = pnand %p844_p13, %p838_p8 }
 0x2d4   : > { %848 = shalt.err (!%p845_p0)
}
 0x2d5   : > { %763 = dma.vmem_to_hbm [thread:$0]  (%p970_p5), %s1025_s30, 16, %s1023_s14, %s598_s15  }
 0x2d6 PF: > { %p769_p1 = scmp.ge.s32.totalorder %s883_s29, 2  ;;  %s622_s25 = sand.u32 1, %s871_s26  }
 0x2d7   : > { %s623_s9 = scalar_lea.sflag [#allocation4], %s622_s25 }
 0x2d8   : > { %p766_p2 = pnand %p769_p1, %p974_p6 }
 0x2da   : > { %866 = dma.done.wait (!%p766_p2), %s623_s9, 16  }
 0x2db   : > { %868 = vsyncadd (!%p766_p2), %s623_s9, 4294967280  ;;  %p18_p3 = scmp.ge.s32.totalorder %s957_s8, 4   ;;  %s1075_s26 = smov %s875_s27 }
 0x2dc   : > { %s1076_s27 = smov %s879_s28  ;;  %s1077_s28 = smov %s968_s11 }
 0x2dd   : > { %s1078_s29 = smov %s957_s8  ;;  %20 = sbr.rel (!%p18_p3) target bundleno = 5 (0x5), region = 83 }
 0x2e4   :  { %627 = vsyncpa [#allocation4], 1 }
 0x2e5   :  { %629 = vsyncpa [#allocation4 + $0x1], 1 }

</bundles_post_ra>
